<compile_context>
chip_gen: v7x
topology: tpu7x:2x2x1
jax: 0.10.0
libtpu: 0.0.40
codegen_flags: <defaults>
</compile_context>

<pallas_src>
import jax
import jax.numpy as jnp
from jax.experimental import pallas as pl
from jax.experimental.pallas import tpu as pltpu


def _scale_kernel(x_ref, a_ref, o_ref):
    # x_ref: (1, tc, ts)   a_ref: (1, tc or 1, ts)   o_ref: (1, tc, ts)
    # A singleton channel dim in a_ref broadcasts across sublanes on the VPU.
    o_ref[...] = (x_ref[...] * a_ref[...]).astype(o_ref.dtype)


def _choose_tiles(C, S, itemsize, budget_bytes):
    """Pick (tc, ts) channel/spatial tiles so one block stays within budget.

    Block-shape rules: second-to-last dim must be a multiple of 8 or the full
    dim; last dim a multiple of 128 or the full dim.
    """
    c_gran = min(8, C)  # sublane granule (full C if C < 8)
    # Spatial tile: full spatial row if a c_gran-row block fits the budget,
    # otherwise the largest 128-multiple that does.
    max_ts = max(128, budget_bytes // (c_gran * itemsize))
    ts = S if S <= max_ts else (max_ts // 128) * 128
    # Channel tile: as many sublane granules as fit the budget.
    tc = (budget_bytes // (ts * itemsize)) // c_gran * c_gran
    tc = min(C, max(c_gran, tc))
    return tc, ts


def scale_spatial_forward(x, a, *, block_budget_bytes=2 * 1024 * 1024):
    """Fused `x * a` with torch broadcasting semantics on NCHW tensors."""
    out_shape = jnp.broadcast_shapes(x.shape, a.shape)
    out_dtype = jnp.result_type(x.dtype, a.dtype)
    assert len(out_shape) == 4, "ScaleSpatial expects NCHW feature maps"
    N, C, H, W = out_shape
    S = H * W

    if x.shape != out_shape:
        # TODO(synk): fuse x-side broadcasts into the index_map as well.
        x = jnp.broadcast_to(x, out_shape)

    channel_broadcast = a.shape == (N, 1, H, W) and C != 1
    if not channel_broadcast and a.shape != out_shape:
        # Uncommon broadcast patterns: materialize (correctness over speed).
        a = jnp.broadcast_to(a, out_shape)

    aC = 1 if channel_broadcast else C
    x3 = x.reshape(N, C, S)          # lane-dense: spatial on the lane axis
    a3 = a.reshape(N, aC, S)

    itemsize = jnp.dtype(out_dtype).itemsize
    tc, ts = _choose_tiles(C, S, itemsize, block_budget_bytes)
    ac = 1 if channel_broadcast else tc
    grid = (N, pl.cdiv(C, tc), pl.cdiv(S, ts))

    def x_map(b, c, s):
        return (b, c, s)

    if channel_broadcast:
        def a_map(b, c, s):
            return (b, 0, s)
    else:
        a_map = x_map

    out3 = pl.pallas_call(
        _scale_kernel,
        out_shape=jax.ShapeDtypeStruct((N, C, S), out_dtype),
        grid=grid,
        in_specs=[
            pl.BlockSpec((1, tc, ts), x_map),
            pl.BlockSpec((1, ac, ts), a_map),
        ],
        out_specs=pl.BlockSpec((1, tc, ts), x_map),
        compiler_params=pltpu.CompilerParams(
            dimension_semantics=("parallel", "parallel", "parallel"),
        ),
    )(x3, a3)

    return out3.reshape(N, C, H, W)


class ScaleSpatial:
    """JAX/Pallas equivalent of yolor's ScaleSpatial module."""

    def __init__(self, layers):
        self.layers = layers

    def __call__(self, x, outputs):
        a = outputs[self.layers[0]]
        return scale_spatial_forward(x, a)


if __name__ == "__main__":
    key = jax.random.PRNGKey(0)
    kx, ka, kb = jax.random.split(key, 3)

    N, C, H, W = 2, 4, 16, 16
    x = jax.random.normal(kx, (N, C, H, W), jnp.float32)

    # Same-shape scale map (generic `x * a`).
    a_full = jax.random.normal(ka, (N, C, H, W), jnp.float32)
    # Per-spatial attention map broadcast over channels (typical ScaleSpatial).
    a_spatial = jax.nn.sigmoid(jax.random.normal(kb, (N, 1, H, W), jnp.float32))

    outputs = [a_full, a_spatial]

    module = ScaleSpatial(layers=[0])
    out_full = jax.block_until_ready(module(x, outputs))

    module.layers = [1]
    out_spatial = jax.block_until_ready(module(x, outputs))

    assert out_full.shape == (N, C, H, W), out_full.shape
    assert out_spatial.shape == (N, C, H, W), out_spatial.shape
    assert out_full.dtype == jnp.float32
    assert jnp.allclose(out_full, x * a_full, atol=1e-6, rtol=1e-6)
    assert jnp.allclose(out_spatial, x * a_spatial, atol=1e-6, rtol=1e-6)

    print("KERNEL_OK")
</pallas_src>

<mosaic_0001>
module attributes {stable_mosaic.version = 11 : i64} {
  func.func @_scale_kernel(%arg0: i32, %arg1: i32, %arg2: i32, %arg3: memref<1x4x256xf32, #tpu.memory_space<vmem>>, %arg4: memref<1x4x256xf32, #tpu.memory_space<vmem>>, %arg5: memref<1x4x256xf32, #tpu.memory_space<vmem>>) attributes {dimension_semantics = [#tpu.dimension_semantics<parallel>, #tpu.dimension_semantics<parallel>, #tpu.dimension_semantics<parallel>], iteration_bounds = array<i64: 2, 1, 1>, scalar_prefetch = 0 : i64, scratch_operands = 0 : i64, tpu.core_type = #tpu.core_type<tc>, window_params = [{transform_indices = @transform_0, window_bounds = array<i64: 1, 4, 256>}, {transform_indices = @transform_1, window_bounds = array<i64: 1, 4, 256>}, {transform_indices = @transform_2, window_bounds = array<i64: 1, 4, 256>}]} {
    %c0 = arith.constant 0 : index
    %c0_0 = arith.constant 0 : index
    %c0_1 = arith.constant 0 : index
    %0 = vector.load %arg3[%c0, %c0_0, %c0_1] : memref<1x4x256xf32, #tpu.memory_space<vmem>>, vector<1x4x256xf32>
    %c0_2 = arith.constant 0 : index
    %c0_3 = arith.constant 0 : index
    %c0_4 = arith.constant 0 : index
    %1 = vector.load %arg4[%c0_2, %c0_3, %c0_4] : memref<1x4x256xf32, #tpu.memory_space<vmem>>, vector<1x4x256xf32>
    %2 = arith.mulf %0, %1 : vector<1x4x256xf32>
    %c0_5 = arith.constant 0 : index
    %c0_6 = arith.constant 0 : index
    %c0_7 = arith.constant 0 : index
    %3 = vector.load %arg5[%c0_5, %c0_6, %c0_7] : memref<1x4x256xf32, #tpu.memory_space<vmem>>, vector<1x4x256xf32>
    tpu.vector_store %arg5[%c0_5, %c0_6, %c0_7], %2 {strides = array<i32>} : memref<1x4x256xf32, #tpu.memory_space<vmem>>, vector<1x4x256xf32>,
    return
  }
  func.func @transform_0(%arg0: i32, %arg1: i32, %arg2: i32) -> (i32, i32, i32) {
    %c0_i32 = arith.constant 0 : i32
    return %arg0, %arg1, %arg2 : i32, i32, i32
  }
  func.func @transform_1(%arg0: i32, %arg1: i32, %arg2: i32) -> (i32, i32, i32) {
    %c0_i32 = arith.constant 0 : i32
    return %arg0, %arg1, %arg2 : i32, i32, i32
  }
  func.func @transform_2(%arg0: i32, %arg1: i32, %arg2: i32) -> (i32, i32, i32) {
    %c0_i32 = arith.constant 0 : i32
    return %arg0, %arg1, %arg2 : i32, i32, i32
  }
}

</mosaic_0001>

<bundles_post_ra>
// kernel: tpu_custom_call.1
= control target key start
LH: loop header
LB: loop body
LE: loop exit
PB: predicated region body
PF: predicated region fallthrough
CT: control target
= control target key end

     0   :  { %7 = vsyncpa [#allocation3], 0  ;;  %s857_s0 = inlined_call_operand.hbm [shape: f32[2,4,256], index: 0, kind: input, shape index: {}]   ;;  %s858_s1 = inlined_call_operand.hbm [shape: f32[2,4,256], index: 1, kind: input, shape index: {}]   ;;  %s859_s2 = inlined_call_operand.hbm [shape: f32[2,4,256], index: 2, kind: output, shape index: {}]  }
   0x1   :  { %9 = vsyncpa [#allocation3 + $0x1], 0 }
   0x2   :  { %10 = vsyncpa [#allocation6], 0 }
   0x3   :  { %12 = vsyncpa [#allocation6 + $0x1], 0 }
   0x4   :  { %13 = vsyncpa [#allocation4], 0 }
   0x5   :  { %15 = vsyncpa [#allocation4 + $0x1], 0  ;;  %s637_s9 = smov 0   ;;  %s639_s10 = smov 0  }
   0x6   :  { %s641_s11 = smov 0   ;;  %s643_s12 = smov 0  }
   0x7   :  { %s645_s13 = smov 0   ;;  %s647_s14 = smov 0  }
   0x8 LB: > { %s382_s15 = sadd.s32 4294967295, %s617_s14   ;;  %s383_s16 = sadd.s32 4294967294, %s617_s14   ;;  %s617_s14 = sphi %s647_s14, %s21_s14   ;;  %s613_s13 = sphi %s645_s13, %s879_s13   ;;  %s609_s12 = sphi %s643_s12, %s878_s12   ;;  %s605_s11 = sphi %s641_s11, %s877_s11   ;;  %s601_s10 = sphi %s639_s10, %s876_s10   ;;  %s597_s9 = sphi %s637_s9, %s875_s9  }
   0x9   : > { %s40_s17 = sadd.s32 1, %s613_s13  ;;  %s51_s18 = sadd.s32 1, %s605_s11 }
   0xa   : > { %p42_p0 = scmp.ge.s32.totalorder %s40_s17, 2  ;;  %p58_p1 = scmp.ne.s32.totalorder %s605_s11, %s601_s10 }
   0xb   : > { %p59_p2 = scmp.eq.s32.totalorder %s617_s14, 0  ;;  %p64_p3 = scmp.ne.s32.totalorder %s601_s10, %s597_s9 }
   0xc   : > { %s881_s17 = smov (%p42_p0, %s40_s17), 0  ;;  %p65_p5 = scmp.eq.s32.totalorder %s382_s15, 0 }
   0xd   : > { %p678_p4 = por %p59_p2, %p58_p1  ;;  %s44_s20 = ssub.s32 %s613_s13, %s881_s17 }
   0xe   : > { %p122_p6 = scmp.eq.s32.totalorder %s382_s15, 1  ;;  %p49_p7 = scmp.eq.s32.totalorder %s44_s20, 0 }
   0xf   : > { %p684_p8 = por %p65_p5, %p64_p3  ;;  %p128_p10 = scmp.eq.s32.totalorder %s383_s16, 1 }
  0x10   : > { %p688_p9 = por %p122_p6, %p58_p1  ;;  %p421_p13 = scmp.lt.s32.totalorder %s617_s14, 2 }
  0x11   : > { %s863_s21 = scalar_select %p684_p8, 1, 0 }
  0x12   : > { %s864_s22 = scalar_select %p688_p9, 1, 0 }
  0x13   : > { %s693_s23 = scalar_select %p49_p7, %s605_s11, %s51_s18  }
  0x14   : > { %p695_p11 = por %p128_p10, %p64_p3  ;;  %s702_s25 = sand.u32 1, %s605_s11  }
  0x15   : > { %s386_s26 = sshll.u32 %s702_s25, 3  ;;  %s401_s27 = sshll.u32 %s613_s13, 7 }
  0x16   : > { %s865_s24 = scalar_select %p695_p11, 1, 0 }
  0x17   : > { %s711_s30 = scalar_lea.hbm %s857_s0, %s401_s27  ;;  %s152_s3 = scalar_lea.vmem [#allocation2], %s386_s26 }
  0x18   : > { %s164_s4 = sshll.u32 %s152_s3, 4  ;;  %p719_p0 = pnand %p421_p13, %p678_p4  ;;  %s715_s4 = int_to_ptr.vmem [resolvable:$true] %s164_s4 }
  0x19   : > { %s149_s6 = scalar_lea.sflag [#allocation3], %s702_s25  ;;  %s471_s7 = scalar_lea.hbm %s711_s30, 128 }
  0x1a   : > { %p472_p3 = scmp.ne.s32.totalorder %s711_s30, %s471_s7  ;;  %p473_p5 = pneg %p719_p0 }
  0x1b   : > { %s476_s16 = scalar_lea.hbm %s857_s0, 256  ;;  %p477_p4 = scmp.lt.u32.totalorder %s711_s30, %s857_s0 }
  0x1c   : > { %p474_p6 = pnand %p473_p5, %p472_p3  ;;  %p478_p10 = scmp.lt.u32.totalorder %s476_s16, %s471_s7 }
  0x1d   : > { %p480_p12 = scmp.lt.u32.totalorder %s471_s7, %s711_s30 }
  0x1e   : > { %p475_p7 = pneg %p474_p6  ;;  %p479_p13 = por %p478_p10, %p477_p4 }
  0x20   : > { %p481_p1 = por %p480_p12, %p479_p13 }
  0x22   : > { %p482_p2 = pnand %p481_p1, %p475_p7 }
  0x24   : > { %485 = shalt.err (!%p482_p2)
}
  0x25   : > { %s486_s20 = scalar_lea.vmem %s715_s4, 128  ;;  %s619_s28 = smov [#allocation2]  }
  0x26   : > { %p487_p3 = scmp.ne.s32.totalorder %s715_s4, %s486_s20  ;;  %s491_s29 = sshll.u32 %s619_s28, 4  ;;  %s492_s29 = int_to_ptr.vmem [resolvable:$false] %s491_s29 }
  0x27   : > { %s493_s3 = scalar_lea.vmem %s492_s29, 256  ;;  %p494_p9 = scmp.lt.s32.totalorder %s715_s4, %s492_s29 }
  0x28   : > { %p489_p6 = pnand %p487_p3, %p473_p5  ;;  %p495_p4 = scmp.lt.s32.totalorder %s493_s3, %s486_s20 }
  0x2a   : > { %p490_p11 = pneg %p489_p6  ;;  %p496_p10 = por %p495_p4, %p494_p9 }
  0x2c   : > { %p497_p12 = pnand %p496_p10, %p490_p11 }
  0x2e   : > { %500 = shalt.err (!%p497_p12)
}
  0x2f   : > { %413 = dma.hbm_to_vmem [thread:$0]  (!%p719_p0), %s711_s30, 128, %s715_s4, %s149_s6  }
  0x30   : > { %p867_p1 = scmp.lt.s32.totalorder %s617_s14, 3  ;;  %p868_p2 = scmp.ge.s32.totalorder %s617_s14, 1 }
  0x31   : > { %s764_s16 = scalar_lea.hbm %s858_s1, %s401_s27  ;;  %s175_s18 = scalar_lea.vmem [#allocation5], %s386_s26 }
  0x32   : > { %p755_p7 = pnand %p868_p2, %p867_p1  ;;  %s187_s19 = sshll.u32 %s175_s18, 4  ;;  %s188_s19 = int_to_ptr.vmem [resolvable:$true] %s187_s19 }
  0x33   : > { %s172_s30 = scalar_lea.sflag [#allocation6], %s702_s25  ;;  %s501_s4 = scalar_lea.hbm %s764_s16, 128 }
  0x34   : > { %s869_s7 = scalar_select %p755_p7, 1, 0 }
  0x35   : > { %p502_p9 = scmp.ne.s32.totalorder %s764_s16, %s501_s4  ;;  %s506_s27 = scalar_lea.hbm %s858_s1, 256 }
  0x36   : > { %p507_p3 = scmp.lt.u32.totalorder %s764_s16, %s858_s1  ;;  %p508_p6 = scmp.lt.u32.totalorder %s506_s27, %s501_s4 }
  0x37   : > { %p504_p11 = pnand %p502_p9, %p473_p5  ;;  %p510_p10 = scmp.lt.u32.totalorder %s501_s4, %s764_s16 }
  0x38   : > { %p509_p4 = por %p508_p6, %p507_p3 }
  0x39   : > { %p505_p13 = pneg %p504_p11 }
  0x3a   : > { %p511_p12 = por %p510_p10, %p509_p4 }
  0x3c   : > { %p512_p1 = pnand %p511_p12, %p505_p13 }
  0x3e   : > { %515 = shalt.err (!%p512_p1)
}
  0x3f   : > { %s516_s25 = scalar_lea.vmem %s188_s19, 128  ;;  %s620_s26 = smov [#allocation5]  }
  0x40   : > { %p517_p2 = scmp.ne.s32.totalorder %s188_s19, %s516_s25  ;;  %s521_s3 = sshll.u32 %s620_s26, 4  ;;  %s522_s3 = int_to_ptr.vmem [resolvable:$false] %s521_s3 }
  0x41   : > { %s523_s8 = scalar_lea.vmem %s522_s3, 256  ;;  %p524_p8 = scmp.lt.s32.totalorder %s188_s19, %s522_s3 }
  0x42   : > { %p519_p9 = pnand %p517_p2, %p473_p5  ;;  %p525_p7 = scmp.lt.s32.totalorder %s523_s8, %s516_s25 }
  0x44   : > { %p520_p11 = pneg %p519_p9  ;;  %p526_p3 = por %p525_p7, %p524_p8 }
  0x46   : > { %p527_p6 = pnand %p526_p3, %p520_p11 }
  0x48   : > { %530 = shalt.err (!%p527_p6)
}
  0x49   : > { %416 = dma.hbm_to_vmem [thread:$0]  (!%p719_p0), %s764_s16, 128, %s188_s19, %s172_s30  }
  0x4a   : > { %p870_p13 = scmp.ne.s32.totalorder %s869_s7, 0 }
  0x4b   : > { %s791_s15 = sand.u32 (!%p870_p13), 1, %s601_s10   ;;  %p871_p5 = scmp.ne.s32.totalorder (!%p870_p13), %s863_s21, 0 }
  0x4c   : > { %196 = sbr.rel (%p870_p13) target bundleno = 112 (0x70), region = 28  ;;  %s393_s18 = sshll.u32 (!%p870_p13), %s791_s15, 3 }
  0x4d   : > { %s199_s4 = scalar_lea.sflag (!%p870_p13), [#allocation3], %s791_s15  ;;  %s202_s6 = scalar_lea.vmem (!%p870_p13), [#allocation2], %s393_s18 }
  0x53   : > { %584 = dma.done.wait (%p871_p5), %s199_s4, 128  }
  0x54   : > { %586 = vsyncadd (%p871_p5), %s199_s4, 4294967168  ;;  %s208_s5 = scalar_lea.sflag [#allocation6], %s791_s15  ;;  %s211_s16 = scalar_lea.vmem [#allocation5], %s393_s18 }
  0x55   : > { %588 = dma.done.wait (%p871_p5), %s208_s5, 128  }
  0x56   : > { %590 = vsyncadd (%p871_p5), %s208_s5, 4294967168  ;;  %s236_s7 = scalar_lea.vmem [#allocation7], %s393_s18  ;;  %s403_s30 = sshll.u32 %s609_s12, 7  ;;  %v240_v0 = vld [vmem:[%s202_s6] sm:$0xff]  ;;  %v241_v1 = vld [vmem:[%s211_s16] sm:$0xff] }
  0x57   : > { %s263_s19 = sshll.u32 %s236_s7, 4  ;;  %v242_v2 = vmul.f32 %v241_v1, %v240_v0  ;;  %s810_s28 = scalar_lea.hbm %s859_s2, %s403_s30  ;;  %s805_s19 = int_to_ptr.vmem [resolvable:$true] %s263_s19 }
  0x58   : > { %s245_s21 = scalar_lea.sflag [#allocation4], %s791_s15  ;;  %s531_s29 = scalar_lea.vmem %s805_s19, 128 }
  0x59   : > { %243 = vst [vmem:[%s236_s7] sm:$0xff] %v242_v2  ;;  %p532_p8 = scmp.ne.s32.totalorder %s805_s19, %s531_s29  ;;  %p872_p0 = scmp.ne.s32.totalorder %s864_s22, 0 }
  0x5a   : > { %s621_s12 = smov [#allocation7]  }
  0x5b   : > { %p533_p7 = pnand %p532_p8, %p872_p0  ;;  %s535_s25 = sshll.u32 %s621_s12, 4  ;;  %s536_s25 = int_to_ptr.vmem [resolvable:$false] %s535_s25 }
  0x5c   : > { %s537_s26 = scalar_lea.vmem %s536_s25, 256  ;;  %p538_p10 = scmp.lt.s32.totalorder %s805_s19, %s536_s25 }
  0x5d   : > { %p534_p4 = pneg %p533_p7  ;;  %p539_p12 = scmp.lt.s32.totalorder %s537_s26, %s531_s29 }
  0x5f   : > { %p540_p1 = por %p539_p12, %p538_p10 }
  0x61   : > { %p541_p2 = pnand %p540_p1, %p534_p4 }
  0x63   : > { %544 = shalt.err (!%p541_p2)
}
  0x64   : > { %s545_s3 = scalar_lea.hbm %s810_s28, 128  ;;  %s549_s18 = scalar_lea.hbm %s859_s2, 256 }
  0x65   : > { %p546_p9 = scmp.ne.s32.totalorder %s810_s28, %s545_s3  ;;  %p550_p6 = scmp.lt.u32.totalorder %s810_s28, %s859_s2 }
  0x66   : > { %p551_p13 = scmp.lt.u32.totalorder %s549_s18, %s545_s3  ;;  %p553_p8 = scmp.lt.u32.totalorder %s545_s3, %s810_s28 }
  0x67   : > { %p547_p11 = pnand %p546_p9, %p872_p0 }
  0x68   : > { %p552_p5 = por %p551_p13, %p550_p6 }
  0x69   : > { %p548_p3 = pneg %p547_p11 }
  0x6a   : > { %p554_p7 = por %p553_p8, %p552_p5 }
  0x6c   : > { %p555_p4 = pnand %p554_p7, %p548_p3 }
  0x6e   : > { %558 = shalt.err (!%p555_p4)
}
  0x6f   : > { %408 = dma.vmem_to_hbm [thread:$0]  (%p872_p0), %s805_s19, 128, %s810_s28, %s245_s21  }
  0x70 PF: > { %s275_s5 = sand.u32 1, %s597_s9   ;;  %p873_p10 = scmp.ne.s32.totalorder %s865_s24, 0 }
  0x71   : > { %p874_p12 = scmp.ge.s32.totalorder %s617_s14, 2  ;;  %s276_s16 = scalar_lea.sflag [#allocation4], %s275_s5 }
  0x73   : > { %p418_p1 = pnand %p874_p12, %p873_p10 }
  0x75   : > { %592 = dma.done.wait (!%p418_p1), %s276_s16, 128  }
  0x76   : > { %594 = vsyncadd (!%p418_p1), %s276_s16, 4294967168  ;;  %s21_s14 = sadd.s32 1, %s617_s14   ;;  %s875_s9 = smov %s601_s10 }
  0x77   : > { %p18_p2 = scmp.ge.s32.totalorder %s21_s14, 4   ;;  %s876_s10 = smov %s605_s11 }
  0x78   : > { %s877_s11 = smov %s693_s23  ;;  %s878_s12 = smov %s613_s13 }
  0x79   : > { %s879_s13 = smov %s881_s17  ;;  %20 = sbr.rel (!%p18_p2) target bundleno = 8 (0x8), region = 86 }
  0x80   :  { %281 = vsyncpa [#allocation3], 1 }
  0x81   :  { %283 = vsyncpa [#allocation3 + $0x1], 1 }
  0x82   :  { %284 = vsyncpa [#allocation6], 1 }
  0x83   :  { %286 = vsyncpa [#allocation6 + $0x1], 1 }
  0x84   :  { %287 = vsyncpa [#allocation4], 1 }
  0x85   :  { %289 = vsyncpa [#allocation4 + $0x1], 1 }

</bundles_post_ra>
